<compile_context>
chip_gen: v7x
topology: tpu7x:2x2x1
jax: 0.10.0
libtpu: 0.0.40
codegen_flags: <defaults>
</compile_context>

<pallas_src>
import functools

import jax
import jax.numpy as jnp
from jax import lax
from jax.experimental import pallas as pl
from jax.experimental.pallas import tpu as pltpu

_LANES = 128
_ROW_QUANTUM = 16  # multiple-of-16 row tiles keep bf16 logits blocks sublane-aligned


def _dice_loss_kernel(x_ref, t_ref, o_ref, inter_ref, sump_ref, count_ref, *,
                      smooth, n_classes, hw_valid, has_pad):
    # x_ref:  (1, C, R, 128) logits, native dtype -- each class is a dense pixel slab
    # t_ref:  (1, R, 128)    int32 labels, dense pixel slab
    # o_ref:  (1, C, 1)      f32 per-class dice for this batch element
    # *_ref scratch: (C, Ra, 128) f32 wide accumulators over HW tiles (Ra = 8 usually)
    h = pl.program_id(1)

    @pl.when(h == 0)
    def _():
        inter_ref[...] = jnp.zeros_like(inter_ref)
        sump_ref[...] = jnp.zeros_like(sump_ref)
        count_ref[...] = jnp.zeros_like(count_ref)

    x = x_ref[0].astype(jnp.float32)                  # (C, R, L) widen in-register
    t = t_ref[0]                                      # (R, L) int32
    _, R, L = x.shape

    # Softmax over the class (leading) axis: leading-axis max/sum unroll into C-way
    # elementwise VPU ops; exp and the approximate reciprocal go to the EUP.
    m = jnp.max(x, axis=0, keepdims=True)             # (1, R, L)
    e = jnp.exp(x - m)                                # (C, R, L)
    denom = jnp.sum(e, axis=0, keepdims=True)         # (1, R, L)
    p = e * pl.reciprocal(denom, approx=True)         # (C, R, L)

    if has_pad:
        rows = lax.broadcasted_iota(jnp.int32, (R, L), 0) + h * R
        lanes = lax.broadcasted_iota(jnp.int32, (R, L), 1)
        valid = (rows * L + lanes) < hw_valid         # mask padded pixels out
    else:
        valid = None

    r_acc = inter_ref.shape[1]

    def fold(v):
        # (R, L) -> (r_acc, L) with pure elementwise VPU adds; the expensive
        # cross-lane/sublane reduce is deferred to the epilogue.
        if R == r_acc:
            return v
        return jnp.sum(v.reshape(R // r_acc, r_acc, L), axis=0)

    for c in range(n_classes):                         # C is small & static: unrolled
        pc = p[c]                                      # (R, L)
        mc = t == c                                    # fused one-hot: scalar compare
        if valid is not None:
            pc = jnp.where(valid, pc, 0.0)
            mc = jnp.logical_and(mc, valid)
        onehot = jnp.where(mc, 1.0, 0.0)
        inter_ref[c] += fold(jnp.where(mc, pc, 0.0))
        sump_ref[c] += fold(pc)
        count_ref[c] += fold(onehot)

    @pl.when(h == pl.num_programs(1) - 1)
    def _():
        def _total(ref):                               # (C, Ra, L) -> (C, 1)
            return jnp.sum(jnp.sum(ref[...], axis=2), axis=1, keepdims=True)

        inter = _total(inter_ref)
        union = _total(sump_ref) + _total(count_ref)
        # exact divide: only C values per batch element, off the hot path
        o_ref[0] = (2.0 * inter + smooth) / (union + smooth)


def _vmem_budget():
    """(block_budget_bytes, vmem_limit_bytes) tuned per TPU generation."""
    try:
        cap = getattr(pltpu.get_tpu_info(), "vmem_capacity_bytes", None)
    except Exception:
        cap = None
    if cap is not None and cap >= (96 << 20):          # v5e / v6e: 128 MiB physical
        return 8 << 20, 64 << 20
    return 4 << 20, 32 << 20                           # v7x (64 MiB per TC) / unknown


def _pick_rows_per_tile(rows_total, n_classes, logits_itemsize, budget_bytes):
    """Rows (of 128 pixels) per HW tile under a per-block VMEM budget."""
    bytes_per_row = _LANES * (n_classes * logits_itemsize + 4)   # logits + int32 labels
    max_rows = max(_ROW_QUANTUM,
                   (budget_bytes // bytes_per_row) // _ROW_QUANTUM * _ROW_QUANTUM)
    if rows_total <= max_rows:
        return rows_total                              # single HW tile (block == full dim)
    return max_rows


def dice_loss_pallas(logits_nchw, targets_nhw, smooth=1.0, rows_per_tile=None):
    """Dice loss matching the PyTorch DiceLoss.forward semantics.

    logits_nchw: (N, C, H, W) float logits (f32 or bf16; streamed in native dtype)
    targets_nhw: (N, H, W) integer class labels in [0, C)
    returns: scalar float32 loss
    """
    N, C, H, W = logits_nchw.shape
    HW = H * W
    L = _LANES
    rows_total = pl.cdiv(HW, L)

    block_budget, vmem_limit = _vmem_budget()
    itemsize = logits_nchw.dtype.itemsize
    if rows_per_tile is None:
        rows_per_tile = _pick_rows_per_tile(rows_total, C, itemsize, block_budget)
    n_tiles = pl.cdiv(rows_total, rows_per_tile)
    if n_tiles > 1:
        sub_q = 16 if itemsize < 4 else 8
        assert rows_per_tile % sub_q == 0, (
            f"multi-tile rows_per_tile must be a multiple of {sub_q} for dtype "
            f"{logits_nchw.dtype}")
    rows_pad = n_tiles * rows_per_tile
    HW_pad = rows_pad * L
    has_pad = HW_pad != HW

    # Logits stay in their native dtype (no wrapper up-cast / extra HBM pass); widening
    # to f32 happens in-register inside the kernel.
    x = logits_nchw.reshape(N, C, HW)
    t = targets_nhw.reshape(N, HW).astype(jnp.int32)
    # TODO(synk): accept int8/uint8 labels directly (needs a 32-row sublane quantum).
    if has_pad:
        x = jnp.pad(x, ((0, 0), (0, 0), (0, HW_pad - HW)))
        t = jnp.pad(t, ((0, 0), (0, HW_pad - HW)))
    x = x.reshape(N, C, rows_pad, L)
    t = t.reshape(N, rows_pad, L)

    r_acc = 8 if rows_per_tile % 8 == 0 else rows_per_tile

    kernel = functools.partial(
        _dice_loss_kernel,
        smooth=float(smooth),
        n_classes=C,
        hw_valid=HW,
        has_pad=has_pad,
    )

    cost = pl.CostEstimate(
        flops=10 * N * C * HW_pad,
        transcendentals=N * C * HW_pad,
        bytes_accessed=N * C * HW_pad * itemsize + N * HW_pad * 4 + N * C * 4,
    )

    # TODO(synk): on v7x with N < 2 TCs, add a parallel HW-split grid axis emitting
    # per-(N, P) partial sums and fold them in the wrapper.
    dice = pl.pallas_call(
        kernel,
        out_shape=jax.ShapeDtypeStruct((N, C, 1), jnp.float32),
        grid_spec=pltpu.PrefetchScalarGridSpec(
            num_scalar_prefetch=0,
            grid=(N, n_tiles),
            in_specs=[
                pl.BlockSpec((1, C, rows_per_tile, L), lambda b, h: (b, 0, h, 0)),
                pl.BlockSpec((1, rows_per_tile, L), lambda b, h: (b, h, 0)),
            ],
            out_specs=pl.BlockSpec((1, C, 1), lambda b, h: (b, 0, 0)),
            scratch_shapes=[
                pltpu.VMEM((C, r_acc, L), jnp.float32),   # intersection
                pltpu.VMEM((C, r_acc, L), jnp.float32),   # sum(p)
                pltpu.VMEM((C, r_acc, L), jnp.float32),   # sum(onehot)
            ],
        ),
        compiler_params=pltpu.CompilerParams(
            dimension_semantics=("parallel", "arbitrary"),
            vmem_limit_bytes=vmem_limit,
        ),
        cost_estimate=cost,
    )(x, t)

    # final mean over (N, C) and the `1 - mean` live in the wrapper (keeps batch parallel)
    return 1.0 - jnp.mean(dice)


def _dice_loss_ref(logits_nchw, targets_nhw, smooth=1.0):
    # Pure-JAX reference mirroring the PyTorch forward exactly.
    N, C, H, W = logits_nchw.shape
    p = jax.nn.softmax(logits_nchw.astype(jnp.float32), axis=1)
    onehot = jax.nn.one_hot(targets_nhw, C, dtype=jnp.float32)         # (N, H, W, C)
    onehot = jnp.transpose(onehot, (0, 3, 1, 2))                       # (N, C, H, W)
    intersection = jnp.sum(p * onehot, axis=(2, 3))
    union = jnp.sum(p, axis=(2, 3)) + jnp.sum(onehot, axis=(2, 3))
    dice = (2.0 * intersection + smooth) / (union + smooth)
    return 1.0 - jnp.mean(dice)


if __name__ == "__main__":
    key = jax.random.PRNGKey(0)
    k1, k2, k3, k4 = jax.random.split(key, 4)

    # Case 1: canonical small shape (no padding, single HW tile).
    N, C, H, W = 2, 4, 16, 16
    logits = jax.random.normal(k1, (N, C, H, W), dtype=jnp.float32)
    targets = jax.random.randint(k2, (N, H, W), 0, C, dtype=jnp.int32)
    ref = jax.block_until_ready(_dice_loss_ref(logits, targets, smooth=1.0))
    out = jax.block_until_ready(dice_loss_pallas(logits, targets, smooth=1.0))
    # approx=True reciprocal in the softmax gives ~1e-4-level relative error.
    assert jnp.allclose(out, ref, atol=2e-3, rtol=2e-3), (out, ref)

    # Case 2: ragged HW (pad + pixel mask) + forced multi-tile scratch accumulation, odd C.
    N2, C2, H2, W2 = 2, 3, 48, 48            # HW=2304 -> 18 rows of 128, padded to 32
    logits2 = jax.random.normal(k3, (N2, C2, H2, W2), dtype=jnp.float32)
    targets2 = jax.random.randint(k4, (N2, H2, W2), 0, C2, dtype=jnp.int32)
    ref2 = jax.block_until_ready(_dice_loss_ref(logits2, targets2, smooth=1.0))
    out2 = jax.block_until_ready(
        dice_loss_pallas(logits2, targets2, smooth=1.0, rows_per_tile=16))
    assert jnp.allclose(out2, ref2, atol=2e-3, rtol=2e-3), (out2, ref2)

    # Case 3: bf16 logits streamed in native dtype (widened in-kernel), aligned rows.
    logits3 = jax.random.normal(k1, (1, 2, 64, 64), dtype=jnp.bfloat16)
    targets3 = jax.random.randint(k2, (1, 64, 64), 0, 2, dtype=jnp.int32)
    ref3 = jax.block_until_ready(_dice_loss_ref(logits3, targets3, smooth=1.0))
    out3 = jax.block_until_ready(dice_loss_pallas(logits3, targets3, smooth=1.0))
    assert jnp.allclose(out3, ref3, atol=5e-3, rtol=5e-3), (out3, ref3)

    print("KERNEL_OK")
</pallas_src>

<mosaic_0001>
module attributes {stable_mosaic.version = 11 : i64} {
  func.func @_dice_loss_kernel(%arg0: i32, %arg1: i32, %arg2: memref<1x4x2x128xf32, #tpu.memory_space<vmem>>, %arg3: memref<1x2x128xi32, #tpu.memory_space<vmem>>, %arg4: memref<1x4x1xf32, #tpu.memory_space<vmem>>, %arg5: memref<4x2x128xf32, #tpu.memory_space<vmem>>, %arg6: memref<4x2x128xf32, #tpu.memory_space<vmem>>, %arg7: memref<4x2x128xf32, #tpu.memory_space<vmem>>) attributes {dimension_semantics = [#tpu.dimension_semantics<parallel>, #tpu.dimension_semantics<arbitrary>], iteration_bounds = array<i64: 2, 1>, scalar_prefetch = 0 : i64, scratch_operands = 3 : i64, tpu.core_type = #tpu.core_type<tc>, window_params = [{transform_indices = @transform_0, window_bounds = array<i64: 1, 4, 2, 128>}, {transform_indices = @transform_1, window_bounds = array<i64: 1, 2, 128>}, {transform_indices = @transform_2, window_bounds = array<i64: 1, 4, 1>}]} {
    %c0_i32 = arith.constant 0 : i32
    %0 = arith.cmpi eq, %arg1, %c0_i32 : i32
    %1 = arith.extui %0 : i1 to i32
    %c0_i32_0 = arith.constant 0 : i32
    %2 = arith.cmpi ne, %1, %c0_i32_0 : i32
    scf.if %2 {
      %cst_92 = arith.constant 0.000000e+00 : f32
      %128 = vector.broadcast %cst_92 : f32 to vector<4x2x128xf32>
      %c0_93 = arith.constant 0 : index
      %c0_94 = arith.constant 0 : index
      %c0_95 = arith.constant 0 : index
      %129 = vector.load %arg5[%c0_93, %c0_94, %c0_95] : memref<4x2x128xf32, #tpu.memory_space<vmem>>, vector<4x2x128xf32>
      tpu.vector_store %arg5[%c0_93, %c0_94, %c0_95], %128 {strides = array<i32>} : memref<4x2x128xf32, #tpu.memory_space<vmem>>, vector<4x2x128xf32>,
      %cst_96 = arith.constant 0.000000e+00 : f32
      %130 = vector.broadcast %cst_96 : f32 to vector<4x2x128xf32>
      %c0_97 = arith.constant 0 : index
      %c0_98 = arith.constant 0 : index
      %c0_99 = arith.constant 0 : index
      %131 = vector.load %arg6[%c0_97, %c0_98, %c0_99] : memref<4x2x128xf32, #tpu.memory_space<vmem>>, vector<4x2x128xf32>
      tpu.vector_store %arg6[%c0_97, %c0_98, %c0_99], %130 {strides = array<i32>} : memref<4x2x128xf32, #tpu.memory_space<vmem>>, vector<4x2x128xf32>,
      %cst_100 = arith.constant 0.000000e+00 : f32
      %132 = vector.broadcast %cst_100 : f32 to vector<4x2x128xf32>
      %c0_101 = arith.constant 0 : index
      %c0_102 = arith.constant 0 : index
      %c0_103 = arith.constant 0 : index
      %133 = vector.load %arg7[%c0_101, %c0_102, %c0_103] : memref<4x2x128xf32, #tpu.memory_space<vmem>>, vector<4x2x128xf32>
      tpu.vector_store %arg7[%c0_101, %c0_102, %c0_103], %132 {strides = array<i32>} : memref<4x2x128xf32, #tpu.memory_space<vmem>>, vector<4x2x128xf32>,
    } else {
    }
    %c0 = arith.constant 0 : index
    %c0_1 = arith.constant 0 : index
    %c0_2 = arith.constant 0 : index
    %c0_3 = arith.constant 0 : index
    %3 = vector.load %arg2[%c0, %c0_1, %c0_2, %c0_3] : memref<1x4x2x128xf32, #tpu.memory_space<vmem>>, vector<1x4x2x128xf32>
    %4 = vector.shape_cast %3 : vector<1x4x2x128xf32> to vector<4x2x128xf32>
    %c0_4 = arith.constant 0 : index
    %c0_5 = arith.constant 0 : index
    %c0_6 = arith.constant 0 : index
    %5 = vector.load %arg3[%c0_4, %c0_5, %c0_6] : memref<1x2x128xi32, #tpu.memory_space<vmem>>, vector<1x2x128xi32>
    %6 = vector.shape_cast %5 : vector<1x2x128xi32> to vector<2x128xi32>
    %cst = arith.constant dense<0xFF800000> : vector<2x128xf32>
    %7 = vector.multi_reduction <maximumf>, %4, %cst [0] : vector<4x2x128xf32> to vector<2x128xf32>
    %8 = vector.shape_cast %7 : vector<2x128xf32> to vector<1x2x128xf32>
    %9 = vector.broadcast %8 : vector<1x2x128xf32> to vector<4x2x128xf32>
    %10 = arith.subf %4, %9 : vector<4x2x128xf32>
    %11 = math.exp %10 : vector<4x2x128xf32>
    %cst_7 = arith.constant dense<0.000000e+00> : vector<2x128xf32>
    %12 = vector.multi_reduction <add>, %11, %cst_7 [0] : vector<4x2x128xf32> to vector<2x128xf32>
    %13 = vector.shape_cast %12 : vector<2x128xf32> to vector<1x2x128xf32>
    %14 = tpu.reciprocal %13 {approx = true} : vector<1x2x128xf32> -> vector<1x2x128xf32>
    %15 = vector.broadcast %14 : vector<1x2x128xf32> to vector<4x2x128xf32>
    %16 = arith.mulf %11, %15 : vector<4x2x128xf32>
    %17 = vector.extract_strided_slice %16 {offsets = [0, 0, 0], sizes = [1, 2, 128], strides = [1, 1, 1]} : vector<4x2x128xf32> to vector<1x2x128xf32>
    %18 = vector.shape_cast %17 : vector<1x2x128xf32> to vector<2x128xf32>
    %c0_i32_8 = arith.constant 0 : i32
    %19 = vector.broadcast %c0_i32_8 : i32 to vector<2x128xi32>
    %20 = arith.cmpi eq, %6, %19 : vector<2x128xi32>
    %cst_9 = arith.constant 1.000000e+00 : f32
    %cst_10 = arith.constant 0.000000e+00 : f32
    %21 = vector.broadcast %cst_9 : f32 to vector<2x128xf32>
    %22 = vector.broadcast %cst_10 : f32 to vector<2x128xf32>
    %23 = arith.select %20, %21, %22 : vector<2x128xi1>, vector<2x128xf32>
    %c0_11 = arith.constant 0 : index
    %c0_12 = arith.constant 0 : index
    %c0_13 = arith.constant 0 : index
    %24 = vector.load %arg5[%c0_11, %c0_12, %c0_13] : memref<4x2x128xf32, #tpu.memory_space<vmem>>, vector<1x2x128xf32>
    %25 = vector.shape_cast %24 : vector<1x2x128xf32> to vector<2x128xf32>
    %cst_14 = arith.constant 0.000000e+00 : f32
    %26 = vector.broadcast %cst_14 : f32 to vector<2x128xf32>
    %27 = arith.select %20, %18, %26 : vector<2x128xi1>, vector<2x128xf32>
    %28 = arith.addf %25, %27 : vector<2x128xf32>
    %c0_15 = arith.constant 0 : index
    %c0_16 = arith.constant 0 : index
    %c0_17 = arith.constant 0 : index
    %29 = vector.load %arg5[%c0_15, %c0_16, %c0_17] : memref<4x2x128xf32, #tpu.memory_space<vmem>>, vector<1x2x128xf32>
    %30 = vector.shape_cast %29 : vector<1x2x128xf32> to vector<2x128xf32>
    %31 = vector.shape_cast %28 : vector<2x128xf32> to vector<1x2x128xf32>
    tpu.vector_store %arg5[%c0_15, %c0_16, %c0_17], %31 {strides = array<i32>} : memref<4x2x128xf32, #tpu.memory_space<vmem>>, vector<1x2x128xf32>,
    %c0_18 = arith.constant 0 : index
    %c0_19 = arith.constant 0 : index
    %c0_20 = arith.constant 0 : index
    %32 = vector.load %arg6[%c0_18, %c0_19, %c0_20] : memref<4x2x128xf32, #tpu.memory_space<vmem>>, vector<1x2x128xf32>
    %33 = vector.shape_cast %32 : vector<1x2x128xf32> to vector<2x128xf32>
    %34 = arith.addf %33, %18 : vector<2x128xf32>
    %c0_21 = arith.constant 0 : index
    %c0_22 = arith.constant 0 : index
    %c0_23 = arith.constant 0 : index
    %35 = vector.load %arg6[%c0_21, %c0_22, %c0_23] : memref<4x2x128xf32, #tpu.memory_space<vmem>>, vector<1x2x128xf32>
    %36 = vector.shape_cast %35 : vector<1x2x128xf32> to vector<2x128xf32>
    %37 = vector.shape_cast %34 : vector<2x128xf32> to vector<1x2x128xf32>
    tpu.vector_store %arg6[%c0_21, %c0_22, %c0_23], %37 {strides = array<i32>} : memref<4x2x128xf32, #tpu.memory_space<vmem>>, vector<1x2x128xf32>,
    %c0_24 = arith.constant 0 : index
    %c0_25 = arith.constant 0 : index
    %c0_26 = arith.constant 0 : index
    %38 = vector.load %arg7[%c0_24, %c0_25, %c0_26] : memref<4x2x128xf32, #tpu.memory_space<vmem>>, vector<1x2x128xf32>
    %39 = vector.shape_cast %38 : vector<1x2x128xf32> to vector<2x128xf32>
    %40 = arith.addf %39, %23 : vector<2x128xf32>
    %c0_27 = arith.constant 0 : index
    %c0_28 = arith.constant 0 : index
    %c0_29 = arith.constant 0 : index
    %41 = vector.load %arg7[%c0_27, %c0_28, %c0_29] : memref<4x2x128xf32, #tpu.memory_space<vmem>>, vector<1x2x128xf32>
    %42 = vector.shape_cast %41 : vector<1x2x128xf32> to vector<2x128xf32>
    %43 = vector.shape_cast %40 : vector<2x128xf32> to vector<1x2x128xf32>
    tpu.vector_store %arg7[%c0_27, %c0_28, %c0_29], %43 {strides = array<i32>} : memref<4x2x128xf32, #tpu.memory_space<vmem>>, vector<1x2x128xf32>,
    %44 = vector.extract_strided_slice %16 {offsets = [1, 0, 0], sizes = [1, 2, 128], strides = [1, 1, 1]} : vector<4x2x128xf32> to vector<1x2x128xf32>
    %45 = vector.shape_cast %44 : vector<1x2x128xf32> to vector<2x128xf32>
    %c1_i32 = arith.constant 1 : i32
    %46 = vector.broadcast %c1_i32 : i32 to vector<2x128xi32>
    %47 = arith.cmpi eq, %6, %46 : vector<2x128xi32>
    %cst_30 = arith.constant 1.000000e+00 : f32
    %cst_31 = arith.constant 0.000000e+00 : f32
    %48 = vector.broadcast %cst_30 : f32 to vector<2x128xf32>
    %49 = vector.broadcast %cst_31 : f32 to vector<2x128xf32>
    %50 = arith.select %47, %48, %49 : vector<2x128xi1>, vector<2x128xf32>
    %c1 = arith.constant 1 : index
    %c0_32 = arith.constant 0 : index
    %c0_33 = arith.constant 0 : index
    %51 = vector.load %arg5[%c1, %c0_32, %c0_33] : memref<4x2x128xf32, #tpu.memory_space<vmem>>, vector<1x2x128xf32>
    %52 = vector.shape_cast %51 : vector<1x2x128xf32> to vector<2x128xf32>
    %cst_34 = arith.constant 0.000000e+00 : f32
    %53 = vector.broadcast %cst_34 : f32 to vector<2x128xf32>
    %54 = arith.select %47, %45, %53 : vector<2x128xi1>, vector<2x128xf32>
    %55 = arith.addf %52, %54 : vector<2x128xf32>
    %c1_35 = arith.constant 1 : index
    %c0_36 = arith.constant 0 : index
    %c0_37 = arith.constant 0 : index
    %56 = vector.load %arg5[%c1_35, %c0_36, %c0_37] : memref<4x2x128xf32, #tpu.memory_space<vmem>>, vector<1x2x128xf32>
    %57 = vector.shape_cast %56 : vector<1x2x128xf32> to vector<2x128xf32>
    %58 = vector.shape_cast %55 : vector<2x128xf32> to vector<1x2x128xf32>
    tpu.vector_store %arg5[%c1_35, %c0_36, %c0_37], %58 {strides = array<i32>} : memref<4x2x128xf32, #tpu.memory_space<vmem>>, vector<1x2x128xf32>,
    %c1_38 = arith.constant 1 : index
    %c0_39 = arith.constant 0 : index
    %c0_40 = arith.constant 0 : index
    %59 = vector.load %arg6[%c1_38, %c0_39, %c0_40] : memref<4x2x128xf32, #tpu.memory_space<vmem>>, vector<1x2x128xf32>
    %60 = vector.shape_cast %59 : vector<1x2x128xf32> to vector<2x128xf32>
    %61 = arith.addf %60, %45 : vector<2x128xf32>
    %c1_41 = arith.constant 1 : index
    %c0_42 = arith.constant 0 : index
    %c0_43 = arith.constant 0 : index
    %62 = vector.load %arg6[%c1_41, %c0_42, %c0_43] : memref<4x2x128xf32, #tpu.memory_space<vmem>>, vector<1x2x128xf32>
    %63 = vector.shape_cast %62 : vector<1x2x128xf32> to vector<2x128xf32>
    %64 = vector.shape_cast %61 : vector<2x128xf32> to vector<1x2x128xf32>
    tpu.vector_store %arg6[%c1_41, %c0_42, %c0_43], %64 {strides = array<i32>} : memref<4x2x128xf32, #tpu.memory_space<vmem>>, vector<1x2x128xf32>,
    %c1_44 = arith.constant 1 : index
    %c0_45 = arith.constant 0 : index
    %c0_46 = arith.constant 0 : index
    %65 = vector.load %arg7[%c1_44, %c0_45, %c0_46] : memref<4x2x128xf32, #tpu.memory_space<vmem>>, vector<1x2x128xf32>
    %66 = vector.shape_cast %65 : vector<1x2x128xf32> to vector<2x128xf32>
    %67 = arith.addf %66, %50 : vector<2x128xf32>
    %c1_47 = arith.constant 1 : index
    %c0_48 = arith.constant 0 : index
    %c0_49 = arith.constant 0 : index
    %68 = vector.load %arg7[%c1_47, %c0_48, %c0_49] : memref<4x2x128xf32, #tpu.memory_space<vmem>>, vector<1x2x128xf32>
    %69 = vector.shape_cast %68 : vector<1x2x128xf32> to vector<2x128xf32>
    %70 = vector.shape_cast %67 : vector<2x128xf32> to vector<1x2x128xf32>
    tpu.vector_store %arg7[%c1_47, %c0_48, %c0_49], %70 {strides = array<i32>} : memref<4x2x128xf32, #tpu.memory_space<vmem>>, vector<1x2x128xf32>,
    %71 = vector.extract_strided_slice %16 {offsets = [2, 0, 0], sizes = [1, 2, 128], strides = [1, 1, 1]} : vector<4x2x128xf32> to vector<1x2x128xf32>
    %72 = vector.shape_cast %71 : vector<1x2x128xf32> to vector<2x128xf32>
    %c2_i32 = arith.constant 2 : i32
    %73 = vector.broadcast %c2_i32 : i32 to vector<2x128xi32>
    %74 = arith.cmpi eq, %6, %73 : vector<2x128xi32>
    %cst_50 = arith.constant 1.000000e+00 : f32
    %cst_51 = arith.constant 0.000000e+00 : f32
    %75 = vector.broadcast %cst_50 : f32 to vector<2x128xf32>
    %76 = vector.broadcast %cst_51 : f32 to vector<2x128xf32>
    %77 = arith.select %74, %75, %76 : vector<2x128xi1>, vector<2x128xf32>
    %c2 = arith.constant 2 : index
    %c0_52 = arith.constant 0 : index
    %c0_53 = arith.constant 0 : index
    %78 = vector.load %arg5[%c2, %c0_52, %c0_53] : memref<4x2x128xf32, #tpu.memory_space<vmem>>, vector<1x2x128xf32>
    %79 = vector.shape_cast %78 : vector<1x2x128xf32> to vector<2x128xf32>
    %cst_54 = arith.constant 0.000000e+00 : f32
    %80 = vector.broadcast %cst_54 : f32 to vector<2x128xf32>
    %81 = arith.select %74, %72, %80 : vector<2x128xi1>, vector<2x128xf32>
    %82 = arith.addf %79, %81 : vector<2x128xf32>
    %c2_55 = arith.constant 2 : index
    %c0_56 = arith.constant 0 : index
    %c0_57 = arith.constant 0 : index
    %83 = vector.load %arg5[%c2_55, %c0_56, %c0_57] : memref<4x2x128xf32, #tpu.memory_space<vmem>>, vector<1x2x128xf32>
    %84 = vector.shape_cast %83 : vector<1x2x128xf32> to vector<2x128xf32>
    %85 = vector.shape_cast %82 : vector<2x128xf32> to vector<1x2x128xf32>
    tpu.vector_store %arg5[%c2_55, %c0_56, %c0_57], %85 {strides = array<i32>} : memref<4x2x128xf32, #tpu.memory_space<vmem>>, vector<1x2x128xf32>,
    %c2_58 = arith.constant 2 : index
    %c0_59 = arith.constant 0 : index
    %c0_60 = arith.constant 0 : index
    %86 = vector.load %arg6[%c2_58, %c0_59, %c0_60] : memref<4x2x128xf32, #tpu.memory_space<vmem>>, vector<1x2x128xf32>
    %87 = vector.shape_cast %86 : vector<1x2x128xf32> to vector<2x128xf32>
    %88 = arith.addf %87, %72 : vector<2x128xf32>
    %c2_61 = arith.constant 2 : index
    %c0_62 = arith.constant 0 : index
    %c0_63 = arith.constant 0 : index
    %89 = vector.load %arg6[%c2_61, %c0_62, %c0_63] : memref<4x2x128xf32, #tpu.memory_space<vmem>>, vector<1x2x128xf32>
    %90 = vector.shape_cast %89 : vector<1x2x128xf32> to vector<2x128xf32>
    %91 = vector.shape_cast %88 : vector<2x128xf32> to vector<1x2x128xf32>
    tpu.vector_store %arg6[%c2_61, %c0_62, %c0_63], %91 {strides = array<i32>} : memref<4x2x128xf32, #tpu.memory_space<vmem>>, vector<1x2x128xf32>,
    %c2_64 = arith.constant 2 : index
    %c0_65 = arith.constant 0 : index
    %c0_66 = arith.constant 0 : index
    %92 = vector.load %arg7[%c2_64, %c0_65, %c0_66] : memref<4x2x128xf32, #tpu.memory_space<vmem>>, vector<1x2x128xf32>
    %93 = vector.shape_cast %92 : vector<1x2x128xf32> to vector<2x128xf32>
    %94 = arith.addf %93, %77 : vector<2x128xf32>
    %c2_67 = arith.constant 2 : index
    %c0_68 = arith.constant 0 : index
    %c0_69 = arith.constant 0 : index
    %95 = vector.load %arg7[%c2_67, %c0_68, %c0_69] : memref<4x2x128xf32, #tpu.memory_space<vmem>>, vector<1x2x128xf32>
    %96 = vector.shape_cast %95 : vector<1x2x128xf32> to vector<2x128xf32>
    %97 = vector.shape_cast %94 : vector<2x128xf32> to vector<1x2x128xf32>
    tpu.vector_store %arg7[%c2_67, %c0_68, %c0_69], %97 {strides = array<i32>} : memref<4x2x128xf32, #tpu.memory_space<vmem>>, vector<1x2x128xf32>,
    %98 = vector.extract_strided_slice %16 {offsets = [3, 0, 0], sizes = [1, 2, 128], strides = [1, 1, 1]} : vector<4x2x128xf32> to vector<1x2x128xf32>
    %99 = vector.shape_cast %98 : vector<1x2x128xf32> to vector<2x128xf32>
    %c3_i32 = arith.constant 3 : i32
    %100 = vector.broadcast %c3_i32 : i32 to vector<2x128xi32>
    %101 = arith.cmpi eq, %6, %100 : vector<2x128xi32>
    %cst_70 = arith.constant 1.000000e+00 : f32
    %cst_71 = arith.constant 0.000000e+00 : f32
    %102 = vector.broadcast %cst_70 : f32 to vector<2x128xf32>
    %103 = vector.broadcast %cst_71 : f32 to vector<2x128xf32>
    %104 = arith.select %101, %102, %103 : vector<2x128xi1>, vector<2x128xf32>
    %c3 = arith.constant 3 : index
    %c0_72 = arith.constant 0 : index
    %c0_73 = arith.constant 0 : index
    %105 = vector.load %arg5[%c3, %c0_72, %c0_73] : memref<4x2x128xf32, #tpu.memory_space<vmem>>, vector<1x2x128xf32>
    %106 = vector.shape_cast %105 : vector<1x2x128xf32> to vector<2x128xf32>
    %cst_74 = arith.constant 0.000000e+00 : f32
    %107 = vector.broadcast %cst_74 : f32 to vector<2x128xf32>
    %108 = arith.select %101, %99, %107 : vector<2x128xi1>, vector<2x128xf32>
    %109 = arith.addf %106, %108 : vector<2x128xf32>
    %c3_75 = arith.constant 3 : index
    %c0_76 = arith.constant 0 : index
    %c0_77 = arith.constant 0 : index
    %110 = vector.load %arg5[%c3_75, %c0_76, %c0_77] : memref<4x2x128xf32, #tpu.memory_space<vmem>>, vector<1x2x128xf32>
    %111 = vector.shape_cast %110 : vector<1x2x128xf32> to vector<2x128xf32>
    %112 = vector.shape_cast %109 : vector<2x128xf32> to vector<1x2x128xf32>
    tpu.vector_store %arg5[%c3_75, %c0_76, %c0_77], %112 {strides = array<i32>} : memref<4x2x128xf32, #tpu.memory_space<vmem>>, vector<1x2x128xf32>,
    %c3_78 = arith.constant 3 : index
    %c0_79 = arith.constant 0 : index
    %c0_80 = arith.constant 0 : index
    %113 = vector.load %arg6[%c3_78, %c0_79, %c0_80] : memref<4x2x128xf32, #tpu.memory_space<vmem>>, vector<1x2x128xf32>
    %114 = vector.shape_cast %113 : vector<1x2x128xf32> to vector<2x128xf32>
    %115 = arith.addf %114, %99 : vector<2x128xf32>
    %c3_81 = arith.constant 3 : index
    %c0_82 = arith.constant 0 : index
    %c0_83 = arith.constant 0 : index
    %116 = vector.load %arg6[%c3_81, %c0_82, %c0_83] : memref<4x2x128xf32, #tpu.memory_space<vmem>>, vector<1x2x128xf32>
    %117 = vector.shape_cast %116 : vector<1x2x128xf32> to vector<2x128xf32>
    %118 = vector.shape_cast %115 : vector<2x128xf32> to vector<1x2x128xf32>
    tpu.vector_store %arg6[%c3_81, %c0_82, %c0_83], %118 {strides = array<i32>} : memref<4x2x128xf32, #tpu.memory_space<vmem>>, vector<1x2x128xf32>,
    %c3_84 = arith.constant 3 : index
    %c0_85 = arith.constant 0 : index
    %c0_86 = arith.constant 0 : index
    %119 = vector.load %arg7[%c3_84, %c0_85, %c0_86] : memref<4x2x128xf32, #tpu.memory_space<vmem>>, vector<1x2x128xf32>
    %120 = vector.shape_cast %119 : vector<1x2x128xf32> to vector<2x128xf32>
    %121 = arith.addf %120, %104 : vector<2x128xf32>
    %c3_87 = arith.constant 3 : index
    %c0_88 = arith.constant 0 : index
    %c0_89 = arith.constant 0 : index
    %122 = vector.load %arg7[%c3_87, %c0_88, %c0_89] : memref<4x2x128xf32, #tpu.memory_space<vmem>>, vector<1x2x128xf32>
    %123 = vector.shape_cast %122 : vector<1x2x128xf32> to vector<2x128xf32>
    %124 = vector.shape_cast %121 : vector<2x128xf32> to vector<1x2x128xf32>
    tpu.vector_store %arg7[%c3_87, %c0_88, %c0_89], %124 {strides = array<i32>} : memref<4x2x128xf32, #tpu.memory_space<vmem>>, vector<1x2x128xf32>,
    %c0_i32_90 = arith.constant 0 : i32
    %125 = arith.cmpi eq, %arg1, %c0_i32_90 : i32
    %126 = arith.extui %125 : i1 to i32
    %c0_i32_91 = arith.constant 0 : i32
    %127 = arith.cmpi ne, %126, %c0_i32_91 : i32
    scf.if %127 {
      %c0_92 = arith.constant 0 : index
      %c0_93 = arith.constant 0 : index
      %c0_94 = arith.constant 0 : index
      %128 = vector.load %arg5[%c0_92, %c0_93, %c0_94] : memref<4x2x128xf32, #tpu.memory_space<vmem>>, vector<4x2x128xf32>
      %cst_95 = arith.constant dense<0.000000e+00> : vector<4x2xf32>
      %129 = vector.multi_reduction <add>, %128, %cst_95 [2] : vector<4x2x128xf32> to vector<4x2xf32>
      %cst_96 = arith.constant dense<0.000000e+00> : vector<4xf32>
      %130 = vector.multi_reduction <add>, %129, %cst_96 [1] : vector<4x2xf32> to vector<4xf32>
      %131 = vector.shape_cast %130 : vector<4xf32> to vector<4x1xf32>
      %c0_97 = arith.constant 0 : index
      %c0_98 = arith.constant 0 : index
      %c0_99 = arith.constant 0 : index
      %132 = vector.load %arg6[%c0_97, %c0_98, %c0_99] : memref<4x2x128xf32, #tpu.memory_space<vmem>>, vector<4x2x128xf32>
      %cst_100 = arith.constant dense<0.000000e+00> : vector<4x2xf32>
      %133 = vector.multi_reduction <add>, %132, %cst_100 [2] : vector<4x2x128xf32> to vector<4x2xf32>
      %cst_101 = arith.constant dense<0.000000e+00> : vector<4xf32>
      %134 = vector.multi_reduction <add>, %133, %cst_101 [1] : vector<4x2xf32> to vector<4xf32>
      %135 = vector.shape_cast %134 : vector<4xf32> to vector<4x1xf32>
      %c0_102 = arith.constant 0 : index
      %c0_103 = arith.constant 0 : index
      %c0_104 = arith.constant 0 : index
      %136 = vector.load %arg7[%c0_102, %c0_103, %c0_104] : memref<4x2x128xf32, #tpu.memory_space<vmem>>, vector<4x2x128xf32>
      %cst_105 = arith.constant dense<0.000000e+00> : vector<4x2xf32>
      %137 = vector.multi_reduction <add>, %136, %cst_105 [2] : vector<4x2x128xf32> to vector<4x2xf32>
      %cst_106 = arith.constant dense<0.000000e+00> : vector<4xf32>
      %138 = vector.multi_reduction <add>, %137, %cst_106 [1] : vector<4x2xf32> to vector<4xf32>
      %139 = vector.shape_cast %138 : vector<4xf32> to vector<4x1xf32>
      %140 = arith.addf %135, %139 : vector<4x1xf32>
      %cst_107 = arith.constant 2.000000e+00 : f32
      %141 = vector.broadcast %cst_107 : f32 to vector<4x1xf32>
      %142 = arith.mulf %141, %131 : vector<4x1xf32>
      %cst_108 = arith.constant 1.000000e+00 : f32
      %143 = vector.broadcast %cst_108 : f32 to vector<4x1xf32>
      %144 = arith.addf %142, %143 : vector<4x1xf32>
      %cst_109 = arith.constant 1.000000e+00 : f32
      %145 = vector.broadcast %cst_109 : f32 to vector<4x1xf32>
      %146 = arith.addf %140, %145 : vector<4x1xf32>
      %147 = arith.divf %144, %146 : vector<4x1xf32>
      %c0_110 = arith.constant 0 : index
      %c0_111 = arith.constant 0 : index
      %c0_112 = arith.constant 0 : index
      %148 = vector.load %arg4[%c0_110, %c0_111, %c0_112] : memref<1x4x1xf32, #tpu.memory_space<vmem>>, vector<1x4x1xf32>
      %149 = vector.shape_cast %148 : vector<1x4x1xf32> to vector<4x1xf32>
      %150 = vector.shape_cast %147 : vector<4x1xf32> to vector<1x4x1xf32>
      tpu.vector_store %arg4[%c0_110, %c0_111, %c0_112], %150 {strides = array<i32>} : memref<1x4x1xf32, #tpu.memory_space<vmem>>, vector<1x4x1xf32>,
    } else {
    }
    return
  }
  func.func @transform_0(%arg0: i32, %arg1: i32) -> (i32, i32, i32, i32) {
    %c0_i32 = arith.constant 0 : i32
    %c0_i32_0 = arith.constant 0 : i32
    %c0_i32_1 = arith.constant 0 : i32
    return %arg0, %c0_i32, %arg1, %c0_i32_0 : i32, i32, i32, i32
  }
  func.func @transform_1(%arg0: i32, %arg1: i32) -> (i32, i32, i32) {
    %c0_i32 = arith.constant 0 : i32
    %c0_i32_0 = arith.constant 0 : i32
    return %arg0, %arg1, %c0_i32 : i32, i32, i32
  }
  func.func @transform_2(%arg0: i32, %arg1: i32) -> (i32, i32, i32) {
    %c0_i32 = arith.constant 0 : i32
    %c0_i32_0 = arith.constant 0 : i32
    %c0_i32_1 = arith.constant 0 : i32
    return %arg0, %c0_i32, %c0_i32_0 : i32, i32, i32
  }
}

</mosaic_0001>

<bundles_post_ra>
// kernel: tpu_custom_call.1
= control target key start
LH: loop header
LB: loop body
LE: loop exit
PB: predicated region body
PF: predicated region fallthrough
CT: control target
= control target key end

     0   :  { %7 = vsyncpa [#allocation6], 0  ;;  %s1023_s0 = inlined_call_operand.hbm [shape: f32[2,4,2,128], index: 0, kind: input, shape index: {}]   ;;  %s1024_s1 = inlined_call_operand.hbm [shape: s32[2,2,128], index: 1, kind: input, shape index: {}]   ;;  %s1025_s2 = inlined_call_operand.vmem [shape: f32[2,4,1], index: 2, kind: output, shape index: {}]  }
   0x1   :  { %9 = vsyncpa [#allocation6 + $0x1], 0 }
   0x2   :  { %10 = vsyncpa [#allocation8], 0 }
   0x3   :  { %12 = vsyncpa [#allocation8 + $0x1], 0  ;;  %s799_s9 = smov 0   ;;  %s801_s10 = smov 0  }
   0x4   :  { %s803_s11 = smov 0   ;;  %s805_s12 = smov 0  }
   0x5   :  { %s807_s13 = smov 0   ;;  %s809_s14 = smov 0  }
   0x6 LB: > { %s572_s15 = sadd.s32 4294967295, %s777_s14   ;;  %s30_s16 = sadd.s32 1, %s773_s13  ;;  %s777_s14 = sphi %s809_s14, %s18_s14   ;;  %s773_s13 = sphi %s807_s13, %s1037_s13   ;;  %s769_s12 = sphi %s805_s12, %s1036_s12   ;;  %s765_s11 = sphi %s803_s11, %s1035_s11   ;;  %s761_s10 = sphi %s801_s10, %s1034_s10   ;;  %s757_s9 = sphi %s799_s9, %s1033_s9  }
   0x7   : > { %p32_p0 = scmp.ge.s32.totalorder %s30_s16, 2  ;;  %s39_s17 = sadd.s32 1, %s765_s11 }
   0x8   : > { %p46_p1 = scmp.ne.s32.totalorder %s765_s11, %s761_s10  ;;  %p47_p2 = scmp.eq.s32.totalorder %s777_s14, 0 }
   0x9   : > { %s1039_s16 = smov (%p32_p0, %s30_s16), 0  ;;  %p52_p4 = scmp.ne.s32.totalorder %s761_s10, %s757_s9 }
   0xa   : > { %p835_p3 = por %p47_p2, %p46_p1  ;;  %s34_s19 = ssub.s32 %s773_s13, %s1039_s16 }
   0xb   : > { %p53_p5 = scmp.eq.s32.totalorder %s572_s15, 0  ;;  %p37_p6 = scmp.eq.s32.totalorder %s34_s19, 0 }
   0xc   : > { %p599_p8 = scmp.lt.s32.totalorder %s777_s14, 2  ;;  %s851_s22 = sand.u32 1, %s765_s11  }
   0xd   : > { %p842_p7 = por %p53_p5, %p52_p4  ;;  %s587_s23 = sshll.u32 %s773_s13, 7 }
   0xe   : > { %s848_s21 = scalar_select %p37_p6, %s765_s11, %s39_s17  }
   0xf   : > { %s1028_s20 = scalar_select %p842_p7, 1, 0 }
  0x10   : > { %s576_s24 = sshll.u32 %s851_s22, 3  ;;  %s858_s27 = scalar_lea.hbm %s1023_s0, %s587_s23 }
  0x11   : > { %s134_s28 = scalar_lea.vmem [#allocation5], %s576_s24  ;;  %p862_p9 = pnand %p599_p8, %p835_p3 }
  0x12   : > { %s142_s29 = sshll.u32 %s134_s28, 4  ;;  %s131_s3 = scalar_lea.sflag [#allocation6], %s851_s22  ;;  %s866_s29 = int_to_ptr.vmem [resolvable:$true] %s142_s29 }
  0x13   : > { %s663_s4 = scalar_lea.hbm %s858_s27, 128  ;;  %p665_p11 = pneg %p862_p9 }
  0x14   : > { %p664_p10 = scmp.ne.s32.totalorder %s858_s27, %s663_s4  ;;  %s668_s7 = scalar_lea.hbm %s1023_s0, 256 }
  0x15   : > { %p669_p0 = scmp.lt.u32.totalorder %s858_s27, %s1023_s0  ;;  %p670_p1 = scmp.lt.u32.totalorder %s668_s7, %s663_s4 }
  0x16   : > { %p666_p12 = pnand %p665_p11, %p664_p10  ;;  %p672_p3 = scmp.lt.u32.totalorder %s663_s4, %s858_s27 }
  0x17   : > { %p671_p2 = por %p670_p1, %p669_p0 }
  0x18   : > { %p667_p13 = pneg %p666_p12 }
  0x19   : > { %p673_p4 = por %p672_p3, %p671_p2 }
  0x1b   : > { %p674_p5 = pnand %p673_p4, %p667_p13 }
  0x1d   : > { %677 = shalt.err (!%p674_p5)
}
  0x1e   : > { %s678_s15 = scalar_lea.vmem %s866_s29, 128  ;;  %s779_s17 = smov [#allocation5]  }
  0x1f   : > { %p679_p6 = scmp.ne.s32.totalorder %s866_s29, %s678_s15  ;;  %s683_s18 = sshll.u32 %s779_s17, 4  ;;  %s684_s18 = int_to_ptr.vmem [resolvable:$false] %s683_s18 }
  0x20   : > { %s685_s19 = scalar_lea.vmem %s684_s18, 256  ;;  %p686_p12 = scmp.lt.s32.totalorder %s866_s29, %s684_s18 }
  0x21   : > { %p681_p8 = pnand %p679_p6, %p665_p11  ;;  %p687_p0 = scmp.lt.s32.totalorder %s685_s19, %s678_s15 }
  0x23   : > { %p682_p10 = pneg %p681_p8  ;;  %p688_p1 = por %p687_p0, %p686_p12 }
  0x25   : > { %p689_p2 = pnand %p688_p1, %p682_p10 }
  0x27   : > { %692 = shalt.err (!%p689_p2)
}
  0x28   : > { %s780_s23 = smov 32   ;;  %s781_s24 = smov 2  }
  0x29   : > { %595 = dma.hbm_to_vmem [thread:$0]  (!%p862_p9), %s858_s27, 128, %s866_s29, %s131_s3, %s780_s23, %s780_s23, %s781_s24  }
  0x2a   : > { %p581_p13 = scmp.ge.s32.totalorder %s777_s14, 1  ;;  %p169_p3 = scmp.lt.s32.totalorder %s777_s14, 3 }
  0x2b   : > { %s579_s25 = sshll.u32 %s851_s22, 1  ;;  %s580_s28 = sshll.u32 %s773_s13, 5 }
  0x2c   : > { %p899_p4 = pnand %p581_p13, %p169_p3  ;;  %s156_s4 = scalar_lea.vmem [#allocation7], %s579_s25 }
  0x2d   : > { %s164_s5 = sshll.u32 %s156_s4, 4  ;;  %s907_s8 = scalar_lea.hbm %s1024_s1, %s580_s28  ;;  %s165_s5 = int_to_ptr.vmem [resolvable:$true] %s164_s5 }
  0x2e   : > { %s1030_s26 = scalar_select %p899_p4, 1, 0 }
  0x2f   : > { %s153_s27 = scalar_lea.sflag [#allocation8], %s851_s22  ;;  %s693_s29 = scalar_lea.hbm %s907_s8, 32 }
  0x30   : > { %p694_p5 = scmp.ne.s32.totalorder %s907_s8, %s693_s29  ;;  %s698_s15 = scalar_lea.hbm %s1024_s1, 64 }
  0x31   : > { %p699_p10 = scmp.lt.u32.totalorder %s907_s8, %s1024_s1  ;;  %p700_p12 = scmp.lt.u32.totalorder %s698_s15, %s693_s29 }
  0x32   : > { %p696_p6 = pnand %p694_p5, %p665_p11  ;;  %p702_p1 = scmp.lt.u32.totalorder %s693_s29, %s907_s8 }
  0x33   : > { %p701_p0 = por %p700_p12, %p699_p10 }
  0x34   : > { %p697_p8 = pneg %p696_p6 }
  0x35   : > { %p703_p2 = por %p702_p1, %p701_p0 }
  0x37   : > { %p704_p13 = pnand %p703_p2, %p697_p8 }
  0x39   : > { %707 = shalt.err (!%p704_p13)
}
  0x3a   : > { %s708_s22 = scalar_lea.vmem %s165_s5, 32  ;;  %s782_s19 = smov [#allocation7]  }
  0x3b   : > { %p709_p3 = scmp.ne.s32.totalorder %s165_s5, %s708_s22  ;;  %s713_s23 = sshll.u32 %s782_s19, 4  ;;  %s714_s23 = int_to_ptr.vmem [resolvable:$false] %s713_s23 }
  0x3c   : > { %s715_s24 = scalar_lea.vmem %s714_s23, 64  ;;  %p716_p7 = scmp.lt.s32.totalorder %s165_s5, %s714_s23 }
  0x3d   : > { %p711_p5 = pnand %p709_p3, %p665_p11  ;;  %p717_p4 = scmp.lt.s32.totalorder %s715_s24, %s708_s22 }
  0x3f   : > { %p712_p6 = pneg %p711_p5  ;;  %p718_p10 = por %p717_p4, %p716_p7 }
  0x41   : > { %p719_p12 = pnand %p718_p10, %p712_p6 }
  0x43   : > { %722 = shalt.err (!%p719_p12)
}
  0x44   : > { %598 = dma.hbm_to_vmem [thread:$0]  (!%p862_p9), %s907_s8, 32, %s165_s5, %s153_s27  }
  0x45   : > { %p1031_p8 = scmp.ne.s32.totalorder %s1030_s26, 0 }
  0x46   : > { %s175_s25 = sand.u32 (!%p1031_p8), 1, %s761_s10   ;;  %p1032_p11 = scmp.ne.s32.totalorder (!%p1031_p8), %s1028_s20, 0 }
  0x47   : > { %173 = sbr.rel (%p1031_p8) target bundleno = 460 (0x1cc), region = 28  ;;  %s582_s28 = sshll.u32 (!%p1031_p8), %s175_s25, 3 }
  0x48   : > { %s176_s4 = scalar_lea.sflag (!%p1031_p8), [#allocation6], %s175_s25  ;;  %s932_s6 = scalar_lea.vmem (!%p1031_p8), [#allocation5], %s582_s28 }
  0x4e   : > { %748 = dma.done.wait (%p1032_p11), %s176_s4, 128  }
  0x4f   : > { %750 = vsyncadd (%p1032_p11), %s176_s4, 4294967168  ;;  %s583_s7 = sshll.u32 %s175_s25, 1  ;;  %s185_s30 = scalar_lea.sflag [#allocation8], %s175_s25 }
  0x50   : > { %s188_s29 = scalar_lea.vmem [#allocation7], %s583_s7 }
  0x51   : > { %752 = dma.done.wait (%p1032_p11), %s185_s30, 32  }
  0x52   : > { %754 = vsyncadd (%p1032_p11), %s185_s30, 4294967264  ;;  %v783_v0 = vmov 0.0   ;;  %vm238_vm0 = vcmask 1041408   ;;  %v942_v1 = vld [vmem:[%s188_s29] sm:$0x3]  ;;  %vm368_vm5 = vcmask 1041409  }
  0x53   : > { %229 = vst [vmem:[#allocation4] sm:$0x3] %v783_v0  ;;  %221 = vst [vmem:[#allocation2] sm:$0x3] %v783_v0  ;;  %v233_v2 = vld [vmem:[%s932_s6] sm:$0x3] }
  0x54   : > { %222 = vst [vmem:[#allocation2 + $0x2] sm:$0x3] %v783_v0  ;;  %223 = vst [vmem:[#allocation2 + $0x4] sm:$0x3] %v783_v0  ;;  %v234_v3 = vld [vmem:[%s932_s6 + $0x2] sm:$0x3] }
  0x55   : > { %224 = vst [vmem:[#allocation2 + $0x6] sm:$0x3] %v783_v0  ;;  %225 = vst [vmem:[#allocation3] sm:$0x3] %v783_v0  ;;  %vm270_vm1 = vcmp.eq.s32.totalorder %v942_v1, 0  ;;  %vm282_vm2 = vcmp.eq.s32.totalorder %v942_v1, 1 }
  0x56   : > { %226 = vst [vmem:[#allocation3 + $0x2] sm:$0x3] %v783_v0  ;;  %227 = vst [vmem:[#allocation3 + $0x4] sm:$0x3] %v783_v0  ;;  %v271_v6 = vsel %vm270_vm1, 1.0, %v783_v0  ;;  %v283_v7 = vsel %vm282_vm2, 1.0, %v783_v0 }
  0x57   : > { %228 = vst [vmem:[#allocation3 + $0x6] sm:$0x3] %v783_v0  ;;  %230 = vst [vmem:[#allocation4 + $0x2] sm:$0x3] %v783_v0  ;;  %vm297_vm3 = vcmp.eq.s32.totalorder %v942_v1, 2  ;;  %v239_v9 = vsel %vm238_vm0, %v233_v2, -inf }
  0x58   : > { %231 = vst [vmem:[#allocation4 + $0x4] sm:$0x3] %v783_v0  ;;  %232 = vst [vmem:[#allocation4 + $0x6] sm:$0x3] %v783_v0  ;;  %v298_v12 = vsel %vm297_vm3, 1.0, %v783_v0  ;;  %v240_v15 = vsel %vm238_vm0, %v234_v3, -inf }
  0x59   : > { %v235_v13 = vld [vmem:[%s932_s6 + $0x4] sm:$0x3]  ;;  %v236_v14 = vld [vmem:[%s932_s6 + $0x6] sm:$0x3]  ;;  %v243_v19 = vmax.f32 %v239_v9, %v240_v15  ;;  %vm312_vm4 = vcmp.eq.s32.totalorder %v942_v1, 3  ;;  %vm370_vm6 = vcmask 1042434  }
  0x5a   : > { %v279_v4 = vld [vmem:[#allocation4] sm:$0x3]  ;;  %v241_v17 = vsel %vm238_vm0, %v235_v13, -inf  ;;  %v242_v18 = vsel %vm238_vm0, %v236_v14, -inf  ;;  %v313_v22 = vsel %vm312_vm4, 1.0, %v783_v0  ;;  %vm372_vm7 = vcmask 1043459  }
  0x5b   : > { %v280_v10 = vadd.f32 %v279_v4, %v271_v6  ;;  %v244_v21 = vmax.f32 %v241_v17, %v242_v18  ;;  %v272_v61 = vld [vmem:[#allocation2] sm:$0x3]  ;;  %v285_v62 = vld [vmem:[#allocation2 + $0x2] sm:$0x3]  ;;  %v300_v63 = vld [vmem:[#allocation2 + $0x4] sm:$0x3] }
  0x5c   : > { %v276_v52 = vld [vmem:[#allocation3] sm:$0x3]  ;;  %v315_v0 = vld [vmem:[#allocation2 + $0x6] sm:$0x3]  ;;  %vm375_vm8 = vcmask 11264   ;;  %p213_p7 = scmp.lt.s32.totalorder %s769_s12, 1 }
  0x5d   : > { %281 = vst [vmem:[#allocation4] sm:$0x3] %v280_v10  ;;  %v245_v23 = vmax.f32 %v243_v19, %v244_v21  ;;  %v290_v54 = vld [vmem:[#allocation3 + $0x2] sm:$0x3]  ;;  %v305_v55 = vld [vmem:[#allocation3 + $0x4] sm:$0x3] }
  0x5e   : > { %v294_v5 = vld [vmem:[#allocation4 + $0x2] sm:$0x3]  ;;  %v320_v56 = vld [vmem:[#allocation3 + $0x6] sm:$0x3]  ;;  %s1041_s12 = smov (!%p213_p7, %s769_s12), 1  ;;  %vm471_vm9 = vcmask 3072  }
  0x5f   : > { %v309_v8 = vld [vmem:[#allocation4 + $0x4] sm:$0x3]  ;;  %v295_v11 = vadd.f32 %v294_v5, %v283_v7  ;;  %v324_v20 = vld [vmem:[#allocation4 + $0x6] sm:$0x3]  ;;  %v246_v25 = vsub.f32 %v233_v2, %v245_v23  ;;  %v247_v26 = vsub.f32 %v234_v3, %v245_v23  ;;  %v248_v27 = vsub.f32 %v235_v13, %v245_v23  ;;  %s584_s20 = sshll.u32 %s1041_s12, 2 }
  0x60   : > { %v310_v16 = vadd.f32 %v309_v8, %v298_v12  ;;  %v325_v24 = vadd.f32 %v324_v20, %v313_v22  ;;  %v249_v28 = vsub.f32 %v236_v14, %v245_v23  ;;  %s216_s8 = scalar_lea.vmem %s1025_s2, %s584_s20 }
  0x61   : > { %296 = vst [vmem:[#allocation4 + $0x2] sm:$0x3] %v295_v11  ;;  %v250_v29 = vmul.f32 1.442695, %v246_v25  ;;  %v252_v30 = vmul.f32 1.442695, %v247_v26 }
  0x62   : > { %311 = vst [vmem:[#allocation4 + $0x4] sm:$0x3] %v310_v16  ;;  %326 = vst [vmem:[#allocation4 + $0x6] sm:$0x3] %v325_v24  ;;  %v254_v31 = vmul.f32 1.442695, %v248_v27 }
  0x63   : > { %v256_v34 = vmul.f32 1.442695, %v249_v28  ;;  %651 = vpow2.f32 %v250_v29  ;;  %v350_v29 = vlaneseq }
  0x64   : > { %v422_v32 = vld [vmem:[#allocation4] sm:$0x3]  ;;  %653 = vpow2.f32 %v252_v30 }
  0x65   : > { %v426_v35 = vsel %vm238_vm0, %v422_v32, 0.0  ;;  %655 = vpow2.f32 %v254_v31  ;;  %v351_v30 = vand.u32 127, %v350_v29  ;;  %v353_v31 = vshrl.u32 %v350_v29, 7 }
  0x66   : > { %427 = vadd.xlane.f32.xlu1 %v426_v35  ;;  %657 = vpow2.f32 %v256_v34 }
  0x68   : > { %v423_v33 = vld [vmem:[#allocation4 + $0x2] sm:$0x3] }
  0x69   : > { %v429_v36 = vsel %vm238_vm0, %v423_v33, 0.0  ;;  %v424_v37 = vld [vmem:[#allocation4 + $0x4] sm:$0x3]  ;;  %v425_v39 = vld [vmem:[#allocation4 + $0x6] sm:$0x3]  ;;  %v354_v33 = vsub.s32 %v351_v30, %v353_v31 }
  0x6a   : > { %430 = vadd.xlane.f32.xlu1 %v429_v36  ;;  %v432_v38 = vsel %vm238_vm0, %v424_v37, 0.0  ;;  %v435_v41 = vsel %vm238_vm0, %v425_v39, 0.0 }
  0x6d   : > { %v652_v40 = vpop.eup %651 }
  0x6e   : > { %433 = vadd.xlane.f32.xlu1 %v432_v38  ;;  %v654_v42 = vpop.eup %653  ;;  %v258_v43 = vsel %vm238_vm0, %v652_v40, 0.0 }
  0x6f   : > { %v656_v44 = vpop.eup %655  ;;  %v259_v45 = vsel %vm238_vm0, %v654_v42, 0.0 }
  0x70   : > { %v658_v46 = vpop.eup %657  ;;  %v260_v47 = vadd.f32 %v259_v45, %v258_v43  ;;  %v261_v48 = vsel %vm238_vm0, %v656_v44, 0.0 }
  0x71   : > { %v263_v49 = vsel %vm238_vm0, %v658_v46, 0.0 }
  0x72   : > { %436 = vadd.xlane.f32.xlu1 %v435_v41  ;;  %v262_v50 = vadd.f32 %v261_v48, %v260_v47 }
  0x74   : > { %v264_v51 = vadd.f32 %v263_v49, %v262_v50 }
  0x76   : > { %659 = vrcp.f32 %v264_v51 }
  0x80   : > { %v660_v53 = vpop.eup %659 }
  0x81   : > { %v266_v57 = vmul.f32 %v660_v53, %v652_v40  ;;  %v267_v58 = vmul.f32 %v660_v53, %v654_v42  ;;  %v268_v59 = vmul.f32 %v660_v53, %v656_v44  ;;  %v269_v60 = vmul.f32 %v660_v53, %v658_v46 }
  0x83   : > { %v277_v2 = vadd.f32 %v276_v52, %v266_v57  ;;  %v291_v3 = vadd.f32 %v290_v54, %v267_v58  ;;  %v306_v4 = vadd.f32 %v305_v55, %v268_v59  ;;  %v321_v5 = vadd.f32 %v320_v56, %v269_v60 }
  0x84   : > { %v273_v6 = vsel %vm270_vm1, %v266_v57, 0.0  ;;  %v286_v7 = vsel %vm282_vm2, %v267_v58, 0.0  ;;  %v301_v8 = vsel %vm297_vm3, %v268_v59, 0.0  ;;  %v316_v9 = vsel %vm312_vm4, %v269_v60, 0.0 }
  0x85   : > { %278 = vst [vmem:[#allocation3] sm:$0x3] %v277_v2  ;;  %292 = vst [vmem:[#allocation3 + $0x2] sm:$0x3] %v291_v3  ;;  %v274_v10 = vadd.f32 %v273_v6, %v272_v61  ;;  %v287_v11 = vadd.f32 %v286_v7, %v285_v62  ;;  %v302_v12 = vadd.f32 %v301_v8, %v300_v63 }
  0x86   : > { %307 = vst [vmem:[#allocation3 + $0x4] sm:$0x3] %v306_v4  ;;  %322 = vst [vmem:[#allocation3 + $0x6] sm:$0x3] %v321_v5  ;;  %v317_v13 = vadd.f32 %v316_v9, %v315_v0 }
  0x87   : > { %275 = vst [vmem:[#allocation2] sm:$0x3] %v274_v10  ;;  %288 = vst [vmem:[#allocation2 + $0x2] sm:$0x3] %v287_v11 }
  0x88   : > { %303 = vst [vmem:[#allocation2 + $0x4] sm:$0x3] %v302_v12  ;;  %318 = vst [vmem:[#allocation2 + $0x6] sm:$0x3] %v317_v13 }
  0x8c   : > { %v379_v14 = vld [vmem:[#allocation3] sm:$0x3]  ;;  %v380_v15 = vld [vmem:[#allocation3 + $0x2] sm:$0x3] }
  0x8d   : > { %v383_v16 = vsel %vm238_vm0, %v379_v14, 0.0  ;;  %v386_v1 = vsel %vm238_vm0, %v380_v15, 0.0  ;;  %v381_v20 = vld [vmem:[#allocation3 + $0x4] sm:$0x3]  ;;  %v382_v23 = vld [vmem:[#allocation3 + $0x6] sm:$0x3] }
  0x8e   : > { %384 = vadd.xlane.f32.xlu0 %v383_v16  ;;  %v331_v17 = vld [vmem:[#allocation2 + $0x2] sm:$0x3]  ;;  %v389_v22 = vsel %vm238_vm0, %v381_v20, 0.0  ;;  %v392_v24 = vsel %vm238_vm0, %v382_v23, 0.0  ;;  %v330_v25 = vld [vmem:[#allocation2] sm:$0x3] }
  0x8f   : > { %v337_v18 = vsel %vm238_vm0, %v331_v17, 0.0  ;;  %v333_v19 = vld [vmem:[#allocation2 + $0x6] sm:$0x3]  ;;  %v334_v26 = vsel %vm238_vm0, %v330_v25, 0.0  ;;  %v332_v27 = vld [vmem:[#allocation2 + $0x4] sm:$0x3] }
  0x90   : > { %338 = vadd.xlane.f32.xlu1 %v337_v18  ;;  %v343_v21 = vsel %vm238_vm0, %v333_v19, 0.0  ;;  %v340_v28 = vsel %vm238_vm0, %v332_v27, 0.0 }
  0x92   : > { %387 = vadd.xlane.f32.xlu0 %v386_v1 }
  0x94   : > { %344 = vadd.xlane.f32.xlu1 %v343_v21 }
  0x96   : > { %390 = vadd.xlane.f32.xlu0 %v389_v22 }
  0x9a   : > { %393 = vadd.xlane.f32.xlu0 %v392_v24 }
  0x9e   : > { %335 = vadd.xlane.f32.xlu0 %v334_v26 }
  0xa2   : > { %341 = vadd.xlane.f32.xlu0 %v340_v28 }
  0xf3   : > { %v428_v32 = vpop.xlane.xlu1 %427 }
  0xf4   : > { %v445_v35 = vrot.slane %v428_v32, %v354_v33 }
  0xf7   : > { %v431_v34 = vpop.xlane.xlu1 %430 }
  0xf8   : > { %v449_v36 = vrot.slane %v431_v34, %v354_v33 }
  0xfa   : > { %v458_v38 = vsel %vm368_vm5, %v449_v36, %v445_v35 }
  0xfb   : > { %v434_v37 = vpop.xlane.xlu1 %433 }
  0xfc   : > { %v453_v39 = vrot.slane %v434_v37, %v354_v33 }
  0xfe   : > { %v459_v41 = vsel %vm370_vm6, %v453_v39, %v458_v38 }
  0xff   : > { %v437_v40 = vpop.xlane.xlu1 %436 }
 0x100   : > { %v457_v42 = vrot.slane %v437_v40, %v354_v33 }
 0x102   : > { %v460_v43 = vsel %vm372_vm7, %v457_v42, %v459_v41 }
 0x103   : > { %v462_v44 = vsel %vm375_vm8, %v460_v43, 0.0 }
 0x104   : > { %463 = vadd.xlane.f32.xlu1 %v462_v44 }
 0x11b   : > { %v385_v45 = vpop.xlane.xlu0 %384 }
 0x11c   : > { %v402_v50 = vrot.slane %v385_v45, %v354_v33 }
 0x11d   : > { %v339_v51 = vpop.xlane.xlu1 %338 }
 0x11e   : > { %v359_v58 = vrot.slane %v339_v51, %v354_v33 }
 0x11f   : > { %v388_v46 = vpop.xlane.xlu0 %387 }
 0x120   : > { %v406_v48 = vrot.slane %v388_v46, %v354_v33 }
 0x121   : > { %v345_v61 = vpop.xlane.xlu1 %344 }
 0x122   : > { %v415_v53 = vsel %vm368_vm5, %v406_v48, %v402_v50  ;;  %v367_v0 = vrot.slane %v345_v61, %v354_v33 }
 0x123   : > { %v391_v47 = vpop.xlane.xlu0 %390 }
 0x124   : > { %v410_v49 = vrot.slane %v391_v47, %v354_v33 }
 0x126   : > { %v416_v55 = vsel %vm370_vm6, %v410_v49, %v415_v53 }
 0x127   : > { %v394_v52 = vpop.xlane.xlu0 %393 }
 0x128   : > { %v414_v54 = vrot.slane %v394_v52, %v354_v33 }
 0x12a   : > { %v417_v56 = vsel %vm372_vm7, %v414_v54, %v416_v55 }
 0x12b   : > { %v336_v57 = vpop.xlane.xlu0 %335  ;;  %v419_v59 = vsel %vm375_vm8, %v417_v56, 0.0 }
 0x12c   : > { %v355_v60 = vrot.slane %v336_v57, %v354_v33  ;;  %420 = vadd.xlane.f32.xlu0 %v419_v59 }
 0x12e   : > { %v369_v62 = vsel %vm368_vm5, %v359_v58, %v355_v60 }
 0x12f   : > { %v342_v63 = vpop.xlane.xlu0 %341 }
 0x130   : > { %v363_v2 = vrot.slane %v342_v63, %v354_v33 }
 0x132   : > { %v371_v3 = vsel %vm370_vm6, %v363_v2, %v369_v62 }
 0x133   : > { %v373_v4 = vsel %vm372_vm7, %v367_v0, %v371_v3 }
 0x134   : > { %v376_v5 = vsel %vm375_vm8, %v373_v4, 0.0 }
 0x135   : > { %377 = vadd.xlane.f32.xlu0 %v376_v5 }
 0x191   : > { %v464_v6 = vpop.xlane.xlu1 %463 }
 0x1b9   : > { %v421_v7 = vpop.xlane.xlu0 %420 }
 0x1ba   : > { %v465_v8 = vadd.f32 %v464_v6, %v421_v7 }
 0x1bc   : > { %v468_v9 = vadd.f32 1.0, %v465_v8 }
 0x1be   : > { %661 = vrcp.f32 %v468_v9 }
 0x1c2   : > { %v378_v10 = vpop.xlane.xlu0 %377 }
 0x1c3   : > { %v466_v11 = vmul.f32 2.0, %v378_v10 }
 0x1c5   : > { %v467_v12 = vadd.f32 1.0, %v466_v11 }
 0x1c8   : > { %v662_v13 = vpop.eup %661 }
 0x1c9   : > { %v470_v14 = vmul.f32 %v662_v13, %v467_v12 }
 0x1cb   : > { %472 = vst.msk [vmem:[%s216_s8] sm:$0xf] %vm471_vm9, %v470_v14 }
 0x1cc PF: > { %s18_s14 = sadd.s32 1, %s777_s14   ;;  %s1033_s9 = smov %s761_s10 }
 0x1cd   : > { %p15_p9 = scmp.ge.s32.totalorder %s18_s14, 4   ;;  %s1034_s10 = smov %s765_s11 }
 0x1ce   : > { %s1035_s11 = smov %s848_s21  ;;  %s1036_s12 = smov %s773_s13 }
 0x1cf   : > { %s1037_s13 = smov %s1039_s16  ;;  %17 = sbr.rel (!%p15_p9) target bundleno = 6 (0x6), region = 98 }
 0x1d6   :  { %492 = vsyncpa [#allocation6], 1 }
 0x1d7   :  { %494 = vsyncpa [#allocation6 + $0x1], 1 }
 0x1d8   :  { %495 = vsyncpa [#allocation8], 1 }
 0x1d9   :  { %497 = vsyncpa [#allocation8 + $0x1], 1 }

</bundles_post_ra>
